<compile_context>
chip_gen: v6e
topology: v6e:2x2x1
jax: 0.10.0
libtpu: 0.0.40
codegen_flags: <defaults>
</compile_context>

<pallas_src>
import functools

import jax
import jax.numpy as jnp
import numpy as np
from jax.experimental import pallas as pl
from jax.experimental.pallas import tpu as pltpu


def _round_up(x, m):
    return ((x + m - 1) // m) * m


def _scatter_kernel(key_ref, lhs_ref, out_ref, *, spatial_p_pad, tile_m,
                    n_chunks):
    """One (batch b, spatial tile t) step: chunked one-hot MXU matmul."""
    b = pl.program_id(0)
    t = pl.program_id(1)
    tile_p = out_ref.shape[-1]

    # target flat keys covered by this output tile: b*P_pad + [t*TP, (t+1)*TP)
    base = b * spatial_p_pad + t * tile_p
    pos = jax.lax.broadcasted_iota(jnp.int32, (1, tile_p), 1) + base

    def chunk(mi):
        i = pl.multiple_of(mi * tile_m, tile_m)
        # (tile_m, TP) one-hot selection; padded pillars carry key = -1 and
        # therefore never match.
        onehot = (key_ref[pl.ds(i, tile_m), :] == pos).astype(lhs_ref.dtype)
        # (C_pad, tile_m) @ (tile_m, TP): features + stat rows in one go.
        return jnp.dot(lhs_ref[:, pl.ds(i, tile_m)], onehot,
                       preferred_element_type=jnp.float32)

    if n_chunks == 1:
        acc = chunk(0)
    else:
        acc = jax.lax.fori_loop(0, n_chunks, lambda mi, a: a + chunk(mi),
                                jnp.zeros(out_ref.shape, jnp.float32),
                                unroll=(n_chunks <= 8))
    out_ref[...] = acc.astype(out_ref.dtype)


def point_pillar_scatter_mae(pillar_features, coords, voxel_num_points,
                             selected_mask, *, batch_size, nx, ny, nz,
                             max_points_per_voxel, tile_p=512, tile_m=2048,
                             compute_dtype=jnp.float32):
    """Returns (spatial_features, gt_occupancy, gt_density, gt_point_number)."""
    assert nz == 1
    M, C = pillar_features.shape
    P = nz * nx * ny

    # ---- tiling / padding (lane = 128, sublane = 8 alignment) ---------------
    assert tile_p % 128 == 0 and tile_m % 128 == 0, (tile_p, tile_m)
    tile_p = min(tile_p, _round_up(P, 128))
    P_pad = _round_up(P, tile_p)

    M_128 = _round_up(max(M, 1), 128)
    tile_m = min(tile_m, M_128)
    M_pad = _round_up(M_128, tile_m)          # MXU K dim / lane aligned
    n_chunks = M_pad // tile_m

    C_aug = C + 2                             # + point-number row + occupancy row
    C_pad = _round_up(C_aug, 8)               # sublane aligned

    # ---- one-time packing in the wrapper (plain XLA ops) --------------------
    coords = coords.astype(jnp.int32)
    key = coords[:, 0] * P_pad + coords[:, 1] + coords[:, 2] * nx + coords[:, 3]
    key_p = jnp.full((M_pad, 1), -1, jnp.int32).at[:M, 0].set(key)

    feats_sel = (pillar_features.astype(compute_dtype)
                 * selected_mask.astype(compute_dtype)[:, None])      # (M, C)
    lhs = jnp.zeros((C_pad, M_pad), compute_dtype)
    lhs = lhs.at[:C, :M].set(feats_sel.T)                             # spatial
    lhs = lhs.at[C, :M].set(voxel_num_points.astype(compute_dtype))   # #points
    lhs = lhs.at[C + 1, :M].set(jnp.ones((M,), compute_dtype))        # occupancy

    # ---- VMEM budget: raise scoped limit only when needed -------------------
    isz = jnp.dtype(compute_dtype).itemsize
    est = (2 * C_pad * M_pad * isz            # resident lhs (double buffered)
           + 2 * M_pad * 128 * 4              # key column (lane padded, 2 bufs)
           + 2 * C_pad * tile_p * 4           # output block (2 bufs)
           + C_pad * tile_p * 4               # accumulator carry
           + 2 * tile_m * tile_p * isz)       # onehot chunk + headroom
    vmem_limit = None
    if est > 32 * 1024 * 1024:
        vmem_limit = min(int(est * 5 // 4), 64 * 1024 * 1024)

    kernel = functools.partial(_scatter_kernel, spatial_p_pad=P_pad,
                               tile_m=tile_m, n_chunks=n_chunks)

    # NOTE: key/lhs index_maps are constant, so Pallas DMAs them only once.
    out = pl.pallas_call(
        kernel,
        out_shape=jax.ShapeDtypeStruct((batch_size, C_pad, P_pad), jnp.float32),
        grid_spec=pltpu.PrefetchScalarGridSpec(
            num_scalar_prefetch=0,
            grid=(batch_size, P_pad // tile_p),
            in_specs=[
                pl.BlockSpec((M_pad, 1), lambda b, t: (0, 0)),
                pl.BlockSpec((C_pad, M_pad), lambda b, t: (0, 0)),
            ],
            out_specs=pl.BlockSpec((None, C_pad, tile_p),
                                   lambda b, t: (b, 0, t)),
        ),
        compiler_params=pltpu.CompilerParams(
            dimension_semantics=("parallel", "parallel"),
            vmem_limit_bytes=vmem_limit),
    )(key_p, lhs)

    spatial_features = out[:, :C, :P].reshape(batch_size, C * nz, ny, nx)  # NCHW
    nump_f = out[:, C, :P]
    gt_occ = out[:, C + 1, :P].reshape(batch_size, ny, nx)
    gt_dens = (nump_f / jnp.float32(max_points_per_voxel)
               ).reshape(batch_size, ny, nx)
    gt_num = jnp.round(nump_f).astype(voxel_num_points.dtype
                                      ).reshape(batch_size, ny, nx)
    return spatial_features, gt_occ, gt_dens, gt_num


def _reference(pillar_features, coords, voxel_num_points, selected_mask,
               batch_size, nx, ny, nz, max_ppv):
    """NumPy re-implementation of the exact torch semantics for verification."""
    pf = np.asarray(pillar_features, np.float32)
    co = np.asarray(coords, np.int64)
    vn = np.asarray(voxel_num_points)
    sm = np.asarray(selected_mask, bool)
    M, C = pf.shape
    P = nz * nx * ny
    spatial = np.zeros((batch_size, C, P), np.float32)
    occ = np.zeros((batch_size, P), np.float32)
    dens = np.zeros((batch_size, P), np.float32)
    nump = np.zeros((batch_size, P), vn.dtype)
    for b in range(batch_size):
        bm = co[:, 0] == b
        tc = co[bm]
        idx = tc[:, 1] + tc[:, 2] * nx + tc[:, 3]
        occ[b, idx] = 1.0
        pn = vn[bm]
        nump[b, idx] = pn
        dens[b, idx] = pn.astype(np.float32) / max_ppv
        bsel = bm & sm
        tcs = co[bsel]
        idxs = tcs[:, 1] + tcs[:, 2] * nx + tcs[:, 3]
        spatial[b][:, idxs] = pf[bsel].T
    return (spatial.reshape(batch_size, C * nz, ny, nx),
            occ.reshape(batch_size, ny, nx),
            dens.reshape(batch_size, ny, nx),
            nump.reshape(batch_size, ny, nx))


def _run_case(seed, *, B, C, nx, ny, max_ppv, M_per_b, mask_ratio, **kw):
    nz = 1
    key = jax.random.PRNGKey(seed)
    k1, k2, k3, k4 = jax.random.split(key, 4)

    # unique flat voxel indices per batch element (as real voxelization gives)
    flats = []
    for b in range(B):
        kk = jax.random.fold_in(k1, b)
        flats.append(jax.random.choice(kk, nx * ny, (M_per_b,), replace=False))
    flat = jnp.concatenate(flats).astype(jnp.int32)
    batch_idx = jnp.repeat(jnp.arange(B, dtype=jnp.int32), M_per_b)
    coords = jnp.stack([batch_idx,
                        jnp.zeros_like(flat),       # z (nz == 1)
                        flat // nx,                 # y
                        flat % nx], axis=1)         # x

    M = B * M_per_b
    pillar_features = jax.random.normal(k2, (M, C), jnp.float32)
    voxel_num_points = jax.random.randint(k3, (M,), 1, max_ppv + 1, jnp.int32)

    # mask_pillars(): deterministic synthetic replacement for torch.rand;
    # selected (unmasked) pillars have uniform >= mask_ratio.
    selected_mask = jax.random.uniform(k4, (M,)) >= mask_ratio

    outs = point_pillar_scatter_mae(
        pillar_features, coords, voxel_num_points, selected_mask,
        batch_size=B, nx=nx, ny=ny, nz=nz, max_points_per_voxel=max_ppv, **kw)
    outs = jax.block_until_ready(outs)
    sp, occ, dens, nump = outs

    ref_sp, ref_occ, ref_dens, ref_nump = _reference(
        pillar_features, coords, voxel_num_points, selected_mask,
        B, nx, ny, nz, max_ppv)

    np.testing.assert_allclose(np.asarray(sp), ref_sp, atol=1e-5, rtol=1e-5)
    np.testing.assert_allclose(np.asarray(occ), ref_occ, atol=1e-6)
    np.testing.assert_allclose(np.asarray(dens), ref_dens, atol=1e-6)
    np.testing.assert_array_equal(np.asarray(nump), ref_nump)


if __name__ == "__main__":
    # base case (128-multiple BEV grid, single M chunk)
    _run_case(0, B=2, C=32, nx=16, ny=16, max_ppv=32, M_per_b=20, mask_ratio=0.5)
    # non-128-multiple BEV grid -> exercises spatial padding path
    _run_case(1, B=2, C=8, nx=20, ny=13, max_ppv=20, M_per_b=17, mask_ratio=0.5)
    # multi-chunk in-kernel M loop
    _run_case(2, B=2, C=16, nx=16, ny=16, max_ppv=32, M_per_b=100,
              mask_ratio=0.5, tile_m=128)
    print("KERNEL_OK")
</pallas_src>

<mosaic_0001>
module attributes {stable_mosaic.version = 11 : i64} {
  func.func @_scatter_kernel(%arg0: i32, %arg1: i32, %arg2: memref<128x1xi32, #tpu.memory_space<vmem>>, %arg3: memref<40x128xf32, #tpu.memory_space<vmem>>, %arg4: memref<1x40x256xf32, #tpu.memory_space<vmem>>) attributes {dimension_semantics = [#tpu.dimension_semantics<parallel>, #tpu.dimension_semantics<parallel>], iteration_bounds = array<i64: 2, 1>, scalar_prefetch = 0 : i64, scratch_operands = 0 : i64, tpu.core_type = #tpu.core_type<tc>, window_params = [{pipeline_mode = #tpu.pipeline_mode<synchronous>, transform_indices = @transform_0, window_bounds = array<i64: 128, 1>}, {pipeline_mode = #tpu.pipeline_mode<synchronous>, transform_indices = @transform_1, window_bounds = array<i64: 40, 128>}, {transform_indices = @transform_2, window_bounds = array<i64: 1, 40, 256>}]} {
    %c256_i32 = arith.constant 256 : i32
    %0 = arith.muli %arg0, %c256_i32 : i32
    %c256_i32_0 = arith.constant 256 : i32
    %1 = arith.muli %arg1, %c256_i32_0 : i32
    %2 = arith.addi %0, %1 : i32
    %3 = tpu.iota {dimensions = array<i32: 1>} : vector<1x256xi32>
    %4 = vector.broadcast %2 : i32 to vector<1x256xi32>
    %5 = arith.addi %3, %4 : vector<1x256xi32>
    %c0_i32 = arith.constant 0 : i32
    %6 = tpu.assume_multiple %c0_i32, 128 : i32
    %7 = arith.index_cast %6 : i32 to index
    %c0 = arith.constant 0 : index
    %8 = vector.load %arg2[%7, %c0] : memref<128x1xi32, #tpu.memory_space<vmem>>, vector<128x1xi32>
    %9 = vector.broadcast %8 : vector<128x1xi32> to vector<128x256xi32>
    %10 = vector.broadcast %5 : vector<1x256xi32> to vector<128x256xi32>
    %11 = arith.cmpi eq, %9, %10 : vector<128x256xi32>
    %12 = arith.extui %11 : vector<128x256xi1> to vector<128x256xi32>
    %13 = arith.sitofp %12 : vector<128x256xi32> to vector<128x256xf32>
    %c0_1 = arith.constant 0 : index
    %14 = arith.index_cast %6 : i32 to index
    %15 = vector.load %arg3[%c0_1, %14] : memref<40x128xf32, #tpu.memory_space<vmem>>, vector<40x128xf32>
    %cst = arith.constant dense<0.000000e+00> : vector<40x256xf32>
    %16 = tpu.matmul %15, %13, %cst {dimension_numbers = #tpu.dot_dimension_numbers<[1], [0], [0], [1], [0, 0, 1, 1], [], []>} : vector<40x128xf32>, vector<128x256xf32>, vector<40x256xf32> -> vector<40x256xf32>
    %c0_2 = arith.constant 0 : index
    %c0_3 = arith.constant 0 : index
    %c0_4 = arith.constant 0 : index
    %17 = vector.load %arg4[%c0_2, %c0_3, %c0_4] : memref<1x40x256xf32, #tpu.memory_space<vmem>>, vector<1x40x256xf32>
    %18 = vector.shape_cast %17 : vector<1x40x256xf32> to vector<40x256xf32>
    %19 = vector.shape_cast %16 : vector<40x256xf32> to vector<1x40x256xf32>
    tpu.vector_store %arg4[%c0_2, %c0_3, %c0_4], %19 {strides = array<i32>} : memref<1x40x256xf32, #tpu.memory_space<vmem>>, vector<1x40x256xf32>,
    return
  }
  func.func @transform_0(%arg0: i32, %arg1: i32) -> (i32, i32) {
    %c0_i32 = arith.constant 0 : i32
    %c0_i32_0 = arith.constant 0 : i32
    %c0_i32_1 = arith.constant 0 : i32
    return %c0_i32, %c0_i32_0 : i32, i32
  }
  func.func @transform_1(%arg0: i32, %arg1: i32) -> (i32, i32) {
    %c0_i32 = arith.constant 0 : i32
    %c0_i32_0 = arith.constant 0 : i32
    %c0_i32_1 = arith.constant 0 : i32
    return %c0_i32, %c0_i32_0 : i32, i32
  }
  func.func @transform_2(%arg0: i32, %arg1: i32) -> (i32, i32, i32) {
    %c0_i32 = arith.constant 0 : i32
    %c0_i32_0 = arith.constant 0 : i32
    return %arg0, %c0_i32, %arg1 : i32, i32, i32
  }
}

</mosaic_0001>

<bundles_post_ra>
// kernel: tpu_custom_call.1
= control target key start
LH: loop header
LB: loop body
LE: loop exit
PB: predicated region body
PF: predicated region fallthrough
CT: control target
= control target key end

     0   :  { %7 = vsyncpa [#allocation3], 0  ;;  %s1038_s0 = inlined_call_operand.vmem [shape: s32[128,1], index: 0, kind: input, shape index: {}]   ;;  %s1039_s1 = inlined_call_operand.vmem [shape: f32[40,128], index: 1, kind: input, shape index: {}]   ;;  %s1040_s2 = inlined_call_operand.hbm [shape: f32[2,40,256], index: 2, kind: output, shape index: {}]  }
   0x1   :  { %9 = vsyncpa [#allocation3 + $0x1], 0  ;;  %s760_s9 = smov 0   ;;  %s762_s10 = smov 0  }
   0x2   :  { %s764_s11 = smov 0   ;;  %s766_s12 = smov 0  }
   0x3   :  { %s768_s13 = smov 0   ;;  %s770_s14 = smov 0  }
   0x4 LB: > { %s493_s15 = sadd.s32 4294967295, %s737_s14   ;;  %s494_s16 = sadd.s32 4294967294, %s737_s14   ;;  %s737_s14 = sphi %s770_s14, %s15_s14   ;;  %s733_s13 = sphi %s768_s13, %s1047_s13   ;;  %s729_s12 = sphi %s766_s12, %s1046_s12   ;;  %s725_s11 = sphi %s764_s11, %s1045_s11   ;;  %s721_s10 = sphi %s762_s10, %s1044_s10   ;;  %s717_s9 = sphi %s760_s9, %s1043_s9  }
   0x5   : > { %s27_s17 = sadd.s32 1, %s733_s13  ;;  %s78_s18 = sadd.s32 1, %s725_s11 }
   0x6   : > { %p29_p0 = scmp.ge.s32.totalorder %s27_s17, 2  ;;  %p88_p1 = scmp.ne.s32.totalorder %s725_s11, %s721_s10 }
   0x7   : > { %p89_p2 = scmp.eq.s32.totalorder %s493_s15, 1  ;;  %p94_p3 = scmp.ne.s32.totalorder %s721_s10, %s717_s9 }
   0x8   : > { %s1049_s17 = smov (%p29_p0, %s27_s17), 0  ;;  %p95_p5 = scmp.eq.s32.totalorder %s494_s16, 1 }
   0x9   : > { %p800_p4 = por %p89_p2, %p88_p1  ;;  %s73_s20 = ssub.s32 %s733_s13, %s1049_s17 }
   0xa   : > { %p496_p6 = scmp.ge.s32.totalorder %s737_s14, 1  ;;  %p76_p7 = scmp.eq.s32.totalorder %s73_s20, 0 }
   0xb   : > { %p807_p8 = por %p95_p5, %p94_p3  ;;  %p119_p9 = scmp.lt.s32.totalorder %s737_s14, 3 }
   0xc   : > { %s813_s22 = scalar_select %p76_p7, %s725_s11, %s78_s18  }
   0xd   : > { %p120_p10 = pnand %p496_p6, %p119_p9 }
   0xe   : > { %s497_s15 = sshll.u32 (!%p120_p10), %s729_s12, 8  ;;  %s133_s30 = sand.u32 (!%p120_p10), 1, %s721_s10  }
   0xf   : > { %123 = sbr.rel (%p120_p10) target bundleno = 398 (0x18e), region = 28  ;;  %s742_s18 = smov (!%p120_p10), [#allocation2]  }
  0x10   : > { %s597_s3 = smul.u32 (!%p120_p10), 80, %s133_s30  ;;  %s665_s20 = sshll.u32 (!%p120_p10), %s742_s18, 4  ;;  %s666_s20 = int_to_ptr.vmem [resolvable:$false] %s665_s20 }
  0x11   : > { %s598_s5 = smul.u32 (!%p120_p10), 1280, %s729_s12  ;;  %s993_s12 = scalar_lea.sflag (!%p120_p10), [#allocation3], %s133_s30 }
  0x12   : > { %s135_s4 = scalar_lea.vmem (!%p120_p10), [#allocation2], %s597_s3  ;;  %s667_s23 = scalar_lea.vmem (!%p120_p10), %s666_s20, 2560 }
  0x13   : > { %s432_s6 = sshll.u32 (!%p120_p10), %s135_s4, 4  ;;  %s991_s6 = int_to_ptr.vmem [resolvable:$true] %s432_s6 }
  0x14   : > { %v161_v0 = vld [vmem:[%s1038_s0 + $0x78] sm:$0xff]  ;;  %v159_v1 = vld [vmem:[%s1038_s0 + $0x68] sm:$0xff]  ;;  %v739_v2 = vmov 0   ;;  %v160_v3 = vld [vmem:[%s1038_s0 + $0x70] sm:$0xff]  ;;  %v740_v17 = vmov 0.0   ;;  %v140_v18 = vlaneseq  ;;  %v143_v21 = vstv %s497_s15  ;;  %s989_s15 = scalar_lea.hbm %s1040_s2, %s598_s5  ;;  %s661_s16 = scalar_lea.vmem %s991_s6, 1280 }
  0x15   : > { %660 = vset.pattern.permute.xlu1 %v739_v2  ;;  %659 = vset.pattern.permute.xlu0 %v739_v2  ;;  %v158_v4 = vld [vmem:[%s1038_s0 + $0x60] sm:$0xff]  ;;  %v157_v5 = vld [vmem:[%s1038_s0 + $0x58] sm:$0xff]  ;;  %v156_v6 = vld [vmem:[%s1038_s0 + $0x50] sm:$0xff]  ;;  %v741_v26 = vmov 1.0   ;;  %p662_p11 = scmp.ne.s32.totalorder %s991_s6, %s661_s16  ;;  %p668_p0 = scmp.lt.s32.totalorder %s991_s6, %s666_s20 }
  0x16   : > { %208 = vperm.xlu0 %659, %v161_v0   ;;  %202 = vperm.xlu1 %660, %v159_v1   ;;  %v155_v7 = vld [vmem:[%s1038_s0 + $0x48] sm:$0xff]  ;;  %v154_v8 = vld [vmem:[%s1038_s0 + $0x40] sm:$0xff]  ;;  %v153_v9 = vld [vmem:[%s1038_s0 + $0x38] sm:$0xff]  ;;  %v141_v19 = vand.u32 127, %v140_v18  ;;  %p669_p1 = scmp.lt.s32.totalorder %s667_s23, %s661_s16 }
  0x17   : > { %v152_v10 = vld [vmem:[%s1038_s0 + $0x30] sm:$0xff]  ;;  %v151_v11 = vld [vmem:[%s1038_s0 + $0x28] sm:$0xff]  ;;  %v150_v12 = vld [vmem:[%s1038_s0 + $0x20] sm:$0xff]  ;;  %375 = vmatprep.mubr.f32.mxu0 %v740_v17  ;;  %393 = vmatprep.mubr.f32.mxu1 %v740_v17  ;;  %p663_p12 = pnand %p662_p11, %p800_p4 }
  0x18   : > { %v149_v13 = vld [vmem:[%s1038_s0 + $0x18] sm:$0xff]  ;;  %v148_v14 = vld [vmem:[%s1038_s0 + $0x10] sm:$0xff]  ;;  %v147_v15 = vld [vmem:[%s1038_s0 + $0x8] sm:$0xff]  ;;  %v142_v20 = vadd.s32 128, %v141_v19  ;;  %v866_v22 = vadd.s32 %v143_v21, %v141_v19  ;;  %p670_p2 = por %p669_p1, %p668_p0 }
  0x19   : > { %v146_v16 = vld [vmem:[%s1038_s0] sm:$0xff]  ;;  %v309_v42 = vld [vmem:[%s1039_s1 + $0x18] sm:$0xff]  ;;  %v307_v43 = vld [vmem:[%s1039_s1 + $0x8] sm:$0xff]  ;;  %p664_p13 = pneg %p663_p12 }
  0x1a   : > { %205 = vperm.xlu0 %659, %v160_v3   ;;  %199 = vperm.xlu1 %660, %v158_v4   ;;  %v868_v23 = vadd.s32 %v143_v21, %v142_v20  ;;  %v306_v41 = vld [vmem:[%s1039_s1] sm:$0xff]  ;;  %v308_v45 = vld [vmem:[%s1039_s1 + $0x10] sm:$0xff] }
  0x1b   : > { %v310_v44 = vld [vmem:[%s1039_s1 + $0x20] sm:$0xff]  ;;  %p671_p3 = pnand %p670_p2, %p664_p13 }
  0x1e   : > { %196 = vperm.xlu0 %659, %v157_v5   ;;  %193 = vperm.xlu1 %660, %v156_v6  }
  0x22   : > { %190 = vperm.xlu0 %659, %v155_v7   ;;  %187 = vperm.xlu1 %660, %v154_v8  }
  0x26   : > { %184 = vperm.xlu0 %659, %v153_v9   ;;  %181 = vperm.xlu1 %660, %v152_v10  }
  0x2a   : > { %178 = vperm.xlu0 %659, %v151_v11   ;;  %175 = vperm.xlu1 %660, %v150_v12  }
  0x2e   : > { %172 = vperm.xlu0 %659, %v149_v13   ;;  %169 = vperm.xlu1 %660, %v148_v14  }
  0x32   : > { %166 = vperm.xlu0 %659, %v147_v15   ;;  %163 = vperm.xlu1 %660, %v146_v16  }
  0x91   : > { %v209_v24 = vpop.permute.xlu0 %208  ;;  %v203_v25 = vpop.permute.xlu1 %202 }
  0x92   : > { %vm241_vm0 = vcmp.eq.s32.totalorder %v209_v24, %v868_v23  ;;  %vm240_vm1 = vcmp.eq.s32.totalorder %v209_v24, %v866_v22  ;;  %vm237_vm4 = vcmp.eq.s32.totalorder %v203_v25, %v868_v23  ;;  %vm236_vm5 = vcmp.eq.s32.totalorder %v203_v25, %v866_v22 }
  0x93   : > { %530 = vmatprep.subr.msk.mxu0 %vm241_vm0, %v741_v26  ;;  %565 = vmatprep.subr.msk.mxu1 %vm241_vm0, %v741_v26 }
  0x94   : > { %531 = vmatpush1.msk.msra.mxu0 %vm240_vm1, %v741_v26  ;;  %581 = vmatpush1.msk.msra.mxu1 %vm240_vm1, %v741_v26 }
  0x95   : > { %v206_v27 = vpop.permute.xlu0 %205  ;;  %v200_v28 = vpop.permute.xlu1 %199 }
  0x96   : > { %vm238_vm2 = vcmp.eq.s32.totalorder %v206_v27, %v866_v22  ;;  %vm239_vm3 = vcmp.eq.s32.totalorder %v206_v27, %v868_v23  ;;  %vm235_vm6 = vcmp.eq.s32.totalorder %v200_v28, %v868_v23  ;;  %vm234_vm7 = vcmp.eq.s32.totalorder %v200_v28, %v866_v22 }
  0x97   : > { %532 = vmatprep.subr.msk.mxu0 %vm239_vm3, %v741_v26  ;;  %566 = vmatprep.subr.msk.mxu1 %vm239_vm3, %v741_v26 }
  0x98   : > { %533 = vmatpush1.msk.msra.mxu0 %vm238_vm2, %v741_v26  ;;  %582 = vmatpush1.msk.msra.mxu1 %vm238_vm2, %v741_v26 }
  0x99   : > { %v197_v29 = vpop.permute.xlu0 %196  ;;  %v194_v30 = vpop.permute.xlu1 %193  ;;  %534 = vmatprep.subr.msk.mxu0 %vm237_vm4, %v741_v26  ;;  %567 = vmatprep.subr.msk.mxu1 %vm237_vm4, %v741_v26 }
  0x9a   : > { %535 = vmatpush1.msk.msra.mxu0 %vm236_vm5, %v741_v26  ;;  %583 = vmatpush1.msk.msra.mxu1 %vm236_vm5, %v741_v26  ;;  %vm233_vm8 = vcmp.eq.s32.totalorder %v197_v29, %v868_v23  ;;  %vm232_vm9 = vcmp.eq.s32.totalorder %v197_v29, %v866_v22  ;;  %vm231_vm10 = vcmp.eq.s32.totalorder %v194_v30, %v868_v23 }
  0x9b   : > { %536 = vmatprep.subr.msk.mxu0 %vm235_vm6, %v741_v26  ;;  %568 = vmatprep.subr.msk.mxu1 %vm235_vm6, %v741_v26  ;;  %vm230_vm11 = vcmp.eq.s32.totalorder %v194_v30, %v866_v22 }
  0x9c   : > { %537 = vmatpush1.msk.msra.mxu0 %vm234_vm7, %v741_v26  ;;  %584 = vmatpush1.msk.msra.mxu1 %vm234_vm7, %v741_v26 }
  0x9d   : > { %v191_v31 = vpop.permute.xlu0 %190  ;;  %v188_v32 = vpop.permute.xlu1 %187  ;;  %538 = vmatprep.subr.msk.mxu0 %vm233_vm8, %v741_v26  ;;  %569 = vmatprep.subr.msk.mxu1 %vm233_vm8, %v741_v26 }
  0x9e   : > { %539 = vmatpush1.msk.msra.mxu0 %vm232_vm9, %v741_v26  ;;  %585 = vmatpush1.msk.msra.mxu1 %vm232_vm9, %v741_v26  ;;  %vm229_vm12 = vcmp.eq.s32.totalorder %v191_v31, %v868_v23  ;;  %vm228_vm13 = vcmp.eq.s32.totalorder %v191_v31, %v866_v22  ;;  %vm227_vm14 = vcmp.eq.s32.totalorder %v188_v32, %v868_v23 }
  0x9f   : > { %540 = vmatprep.subr.msk.mxu0 %vm231_vm10, %v741_v26  ;;  %570 = vmatprep.subr.msk.mxu1 %vm231_vm10, %v741_v26  ;;  %vm226_vm15 = vcmp.eq.s32.totalorder %v188_v32, %v866_v22 }
  0xa0   : > { %541 = vmatpush1.msk.msra.mxu0 %vm230_vm11, %v741_v26  ;;  %586 = vmatpush1.msk.msra.mxu1 %vm230_vm11, %v741_v26 }
  0xa1   : > { %v185_v33 = vpop.permute.xlu0 %184  ;;  %v182_v34 = vpop.permute.xlu1 %181  ;;  %542 = vmatprep.subr.msk.mxu0 %vm229_vm12, %v741_v26  ;;  %571 = vmatprep.subr.msk.mxu1 %vm229_vm12, %v741_v26 }
  0xa2   : > { %543 = vmatpush1.msk.msra.mxu0 %vm228_vm13, %v741_v26  ;;  %587 = vmatpush1.msk.msra.mxu1 %vm228_vm13, %v741_v26  ;;  %vm225_vm0 = vcmp.eq.s32.totalorder %v185_v33, %v868_v23  ;;  %vm224_vm1 = vcmp.eq.s32.totalorder %v185_v33, %v866_v22  ;;  %vm223_vm2 = vcmp.eq.s32.totalorder %v182_v34, %v868_v23 }
  0xa3   : > { %544 = vmatprep.subr.msk.mxu0 %vm227_vm14, %v741_v26  ;;  %572 = vmatprep.subr.msk.mxu1 %vm227_vm14, %v741_v26  ;;  %vm222_vm3 = vcmp.eq.s32.totalorder %v182_v34, %v866_v22 }
  0xa4   : > { %545 = vmatpush1.msk.msra.mxu0 %vm226_vm15, %v741_v26  ;;  %588 = vmatpush1.msk.msra.mxu1 %vm226_vm15, %v741_v26 }
  0xa5   : > { %v179_v35 = vpop.permute.xlu0 %178  ;;  %v176_v36 = vpop.permute.xlu1 %175  ;;  %546 = vmatprep.subr.msk.mxu0 %vm225_vm0, %v741_v26  ;;  %573 = vmatprep.subr.msk.mxu1 %vm225_vm0, %v741_v26 }
  0xa6   : > { %547 = vmatpush1.msk.msra.mxu0 %vm224_vm1, %v741_v26  ;;  %589 = vmatpush1.msk.msra.mxu1 %vm224_vm1, %v741_v26  ;;  %vm221_vm4 = vcmp.eq.s32.totalorder %v179_v35, %v868_v23  ;;  %vm220_vm5 = vcmp.eq.s32.totalorder %v179_v35, %v866_v22  ;;  %vm219_vm6 = vcmp.eq.s32.totalorder %v176_v36, %v868_v23 }
  0xa7   : > { %548 = vmatprep.subr.msk.mxu0 %vm223_vm2, %v741_v26  ;;  %574 = vmatprep.subr.msk.mxu1 %vm223_vm2, %v741_v26  ;;  %vm218_vm7 = vcmp.eq.s32.totalorder %v176_v36, %v866_v22 }
  0xa8   : > { %549 = vmatpush1.msk.msra.mxu0 %vm222_vm3, %v741_v26  ;;  %590 = vmatpush1.msk.msra.mxu1 %vm222_vm3, %v741_v26 }
  0xa9   : > { %v173_v37 = vpop.permute.xlu0 %172  ;;  %v170_v38 = vpop.permute.xlu1 %169  ;;  %550 = vmatprep.subr.msk.mxu0 %vm221_vm4, %v741_v26  ;;  %575 = vmatprep.subr.msk.mxu1 %vm221_vm4, %v741_v26 }
  0xaa   : > { %551 = vmatpush1.msk.msra.mxu0 %vm220_vm5, %v741_v26  ;;  %591 = vmatpush1.msk.msra.mxu1 %vm220_vm5, %v741_v26  ;;  %vm217_vm8 = vcmp.eq.s32.totalorder %v173_v37, %v868_v23  ;;  %vm216_vm9 = vcmp.eq.s32.totalorder %v173_v37, %v866_v22  ;;  %vm215_vm10 = vcmp.eq.s32.totalorder %v170_v38, %v868_v23 }
  0xab   : > { %552 = vmatprep.subr.msk.mxu0 %vm219_vm6, %v741_v26  ;;  %576 = vmatprep.subr.msk.mxu1 %vm219_vm6, %v741_v26  ;;  %vm214_vm11 = vcmp.eq.s32.totalorder %v170_v38, %v866_v22 }
  0xac   : > { %553 = vmatpush1.msk.msra.mxu0 %vm218_vm7, %v741_v26  ;;  %592 = vmatpush1.msk.msra.mxu1 %vm218_vm7, %v741_v26 }
  0xad   : > { %v167_v39 = vpop.permute.xlu0 %166  ;;  %554 = vmatprep.subr.msk.mxu0 %vm217_vm8, %v741_v26  ;;  %577 = vmatprep.subr.msk.mxu1 %vm217_vm8, %v741_v26  ;;  %v164_v40 = vpop.permute.xlu1 %163 }
  0xae   : > { %555 = vmatpush1.msk.msra.mxu0 %vm216_vm9, %v741_v26  ;;  %593 = vmatpush1.msk.msra.mxu1 %vm216_vm9, %v741_v26  ;;  %vm213_vm12 = vcmp.eq.s32.totalorder %v167_v39, %v868_v23  ;;  %vm212_vm13 = vcmp.eq.s32.totalorder %v167_v39, %v866_v22  ;;  %vm211_vm14 = vcmp.eq.s32.totalorder %v164_v40, %v868_v23 }
  0xaf   : > { %556 = vmatprep.subr.msk.mxu0 %vm215_vm10, %v741_v26  ;;  %578 = vmatprep.subr.msk.mxu1 %vm215_vm10, %v741_v26  ;;  %vm210_vm15 = vcmp.eq.s32.totalorder %v164_v40, %v866_v22 }
  0xb0   : > { %557 = vmatpush1.msk.msra.mxu0 %vm214_vm11, %v741_v26  ;;  %594 = vmatpush1.msk.msra.mxu1 %vm214_vm11, %v741_v26 }
  0xb1   : > { %558 = vmatprep.subr.msk.mxu0 %vm213_vm12, %v741_v26  ;;  %579 = vmatprep.subr.msk.mxu1 %vm213_vm12, %v741_v26 }
  0xb2   : > { %559 = vmatpush1.msk.msra.mxu0 %vm212_vm13, %v741_v26  ;;  %595 = vmatpush1.msk.msra.mxu1 %vm212_vm13, %v741_v26 }
  0xb3   : > { %560 = vmatprep.subr.msk.mxu0 %vm211_vm14, %v741_v26  ;;  %580 = vmatprep.subr.msk.mxu1 %vm211_vm14, %v741_v26 }
  0xb4   : > { %561 = vmatpush1.msk.msra.mxu0 %vm210_vm15, %v741_v26  ;;  %596 = vmatpush1.msk.msra.mxu1 %vm210_vm15, %v741_v26 }
  0xb5   : > { %376 = vmatmul.mubr.f32.vlgmr.msra.gmra.mxu0 %v306_v41  ;;  %394 = vmatmul.mubr.f32.vlgmr.msra.gmra.mxu1 %v309_v42 }
  0xb6   : > { %381 = vmatprep.mubr.f32.mxu0 %v740_v17  ;;  %399 = vmatprep.mubr.f32.mxu1 %v740_v17 }
  0xb9   : > { %382 = vmatmul.mubr.f32.gmra.mxu0 %v307_v43  ;;  %400 = vmatmul.mubr.f32.gmra.mxu1 %v310_v44 }
  0xba   : > { %387 = vmatprep.mubr.f32.mxu0 %v740_v17 }
  0xbd   : > { %388 = vmatmul.mubr.f32.gmra.mxu0 %v308_v45 }
 0x175   : > { %v377_v46 = vpop.f32.mrf.mxu0  ;;  %v395_v47 = vpop.f32.mrf.mxu1 }
 0x176   : > { %406 = vst [vmem:[%s135_s4] sm:$0xff] %v377_v46  ;;  %412 = vst [vmem:[%s135_s4 + $0x30] sm:$0xff] %v395_v47 }
 0x177   : > { %v379_v48 = vpop.f32.mrf.mxu0  ;;  %v397_v49 = vpop.f32.mrf.mxu1 }
 0x178   : > { %407 = vst [vmem:[%s135_s4 + $0x8] sm:$0xff] %v379_v48  ;;  %413 = vst [vmem:[%s135_s4 + $0x38] sm:$0xff] %v397_v49 }
 0x179   : > { %v383_v50 = vpop.f32.mrf.mxu0  ;;  %v401_v51 = vpop.f32.mrf.mxu1 }
 0x17a   : > { %408 = vst [vmem:[%s135_s4 + $0x10] sm:$0xff] %v383_v50  ;;  %414 = vst [vmem:[%s135_s4 + $0x40] sm:$0xff] %v401_v51 }
 0x17b   : > { %v385_v52 = vpop.f32.mrf.mxu0  ;;  %v403_v53 = vpop.f32.mrf.mxu1 }
 0x17c   : > { %409 = vst [vmem:[%s135_s4 + $0x18] sm:$0xff] %v385_v52  ;;  %415 = vst [vmem:[%s135_s4 + $0x48] sm:$0xff] %v403_v53 }
 0x17d   : > { %v389_v54 = vpop.f32.mrf.mxu0 }
 0x17e   : > { %410 = vst [vmem:[%s135_s4 + $0x20] sm:$0xff] %v389_v54 }
 0x17f   : > { %v391_v55 = vpop.f32.mrf.mxu0 }
 0x180   : > { %411 = vst [vmem:[%s135_s4 + $0x28] sm:$0xff] %v391_v55 }
 0x181   : > { %674 = shalt.err (!%p671_p3)
}
 0x182   : > { %s675_s24 = scalar_lea.hbm %s989_s15, 1280  ;;  %s679_s27 = scalar_lea.hbm %s1040_s2, 2560 }
 0x183   : > { %p676_p5 = scmp.ne.s32.totalorder %s989_s15, %s675_s24  ;;  %p680_p9 = scmp.lt.s32.totalorder %s989_s15, %s1040_s2 }
 0x184   : > { %p681_p10 = scmp.lt.s32.totalorder %s679_s27, %s675_s24 }
 0x185   : > { %p677_p6 = pnand %p676_p5, %p800_p4 }
 0x186   : > { %p682_p11 = por %p681_p10, %p680_p9 }
 0x187   : > { %p678_p7 = pneg %p677_p6 }
 0x189   : > { %p683_p12 = pnand %p682_p11, %p678_p7 }
 0x18b   : > { %686 = shalt.err (!%p683_p12)
}
 0x18c   : > { %s743_s30 = smov 256   ;;  %s744_s3 = smov 16  }
 0x18d   : > { %599 = dma.vmem_to_hbm [thread:$0]  (%p800_p4), %s991_s6, 1280, %s989_s15, %s993_s12, %s743_s30, %s743_s30, %s744_s3  }
 0x18e PF: > { %p605_p13 = scmp.ge.s32.totalorder %s737_s14, 2  ;;  %s447_s4 = sand.u32 1, %s717_s9  }
 0x18f   : > { %s448_s5 = scalar_lea.sflag [#allocation3], %s447_s4 }
 0x190   : > { %p602_p0 = pnand %p605_p13, %p807_p8 }
 0x192   : > { %p603_p1 = pneg %p602_p0 }
 0x194   : > { %712 = dma.done.wait (%p603_p1), %s448_s5, 1280  }
 0x195   : > { %714 = vsyncadd (%p603_p1), %s448_s5, 4294966016  ;;  %s15_s14 = sadd.s32 1, %s737_s14   ;;  %s1043_s9 = smov %s721_s10 }
 0x196   : > { %p12_p2 = scmp.ge.s32.totalorder %s15_s14, 4   ;;  %s1044_s10 = smov %s725_s11 }
 0x197   : > { %s1045_s11 = smov %s813_s22  ;;  %s1046_s12 = smov %s733_s13 }
 0x198   : > { %s1047_s13 = smov %s1049_s17  ;;  %14 = sbr.rel (!%p12_p2) target bundleno = 4 (0x4), region = 60 }
 0x19d   :  { %453 = vsyncpa [#allocation3], 1 }
 0x19e   :  { %455 = vsyncpa [#allocation3 + $0x1], 1 }

</bundles_post_ra>
